<compile_context>
chip_gen: v6e
topology: v6e:2x2x1
jax: 0.10.0
libtpu: 0.0.40
codegen_flags: <defaults>
</compile_context>

<pallas_src>
import warnings

import jax
import jax.numpy as jnp
from jax.experimental import pallas as pl
from jax.experimental.pallas import tpu as pltpu

_LANE = 128


def _sublane_multiple(dtype) -> int:
    # f32 -> 8 sublanes, bf16/f16 -> 16, int8/fp8 -> 32.
    itemsize = jnp.dtype(dtype).itemsize
    return 8 * max(1, 4 // itemsize)


def _round_up(v, m):
    return ((v + m - 1) // m) * m


def _choose_block(dim, cap, mult):
    """Largest multiple of `mult` that divides `dim` and is <= cap.

    Returns the full dim if it already fits under the cap. `dim` is assumed to
    be a multiple of `mult` whenever dim > cap (the wrapper pads it)."""
    if dim <= cap:
        return dim
    d = (cap // mult) * mult
    while d > mult:
        if dim % d == 0:
            return d
        d -= mult
    return mult


def _affine_kernel(x_ref, scale_ref, shift_ref, o_ref):
    # Single fused multiply-add, lane-dense store.
    o_ref[...] = x_ref[...] * scale_ref[...] + shift_ref[...]


def _apply_fn_pallas(x2, scale2, shift2):
    """Tiled, pipelined per-row affine: out = x2 * scale2 + shift2 (in place)."""
    rows, lanes = x2.shape
    itemsize = jnp.dtype(x2.dtype).itemsize
    sub = _sublane_multiple(x2.dtype)

    # ~8 MiB per buffer max (f32: 512 x 4096). Double-buffered in + out stays
    # <= ~32 MiB, under the explicit 48 MiB scoped-VMEM limit below.
    cap_lanes = 4096
    cap_rows = max(sub, (8 * 1024 * 1024) // (cap_lanes * itemsize))

    block_lanes = _choose_block(lanes, cap_lanes, _LANE)
    block_rows = _choose_block(rows, cap_rows, sub)

    # v7x megacore: if a large array collapsed into a single block, split rows
    # so both TensorCores get grid blocks (each drives its own DMA stream).
    if (rows == block_rows and lanes == block_lanes
            and rows % (2 * sub) == 0
            and rows * lanes * itemsize >= (4 << 20)):
        block_rows = rows // 2

    grid = (rows // block_rows, lanes // block_lanes)  # lanes (j) innermost

    nbytes = rows * lanes * itemsize
    cost = pl.CostEstimate(
        flops=2 * rows * lanes,
        transcendentals=0,
        bytes_accessed=2 * nbytes + 2 * rows * itemsize,
    )

    return pl.pallas_call(
        _affine_kernel,
        out_shape=jax.ShapeDtypeStruct((rows, lanes), x2.dtype),
        grid_spec=pltpu.PrefetchScalarGridSpec(
            num_scalar_prefetch=0,
            grid=grid,
            in_specs=[
                pl.BlockSpec((block_rows, block_lanes), lambda i, j: (i, j)),
                pl.BlockSpec((block_rows, 1), lambda i, j: (i, 0)),
                pl.BlockSpec((block_rows, 1), lambda i, j: (i, 0)),
            ],
            out_specs=pl.BlockSpec((block_rows, block_lanes), lambda i, j: (i, j)),
        ),
        compiler_params=pltpu.CompilerParams(
            dimension_semantics=("parallel", "parallel"),
            vmem_limit_bytes=48 * 1024 * 1024,
        ),
        cost_estimate=cost,
        input_output_aliases={0: 0},   # write the affine result in place
    )(x2, scale2, shift2)


def _random_apply_impl(x, scale, shift, p, key):
    """x: (N, C, H, W); scale/shift: (C,); p: probability of applying fn."""
    N, C, H, W = x.shape
    rows, lanes = N * C, H * W
    sub = _sublane_multiple(x.dtype)
    rows_p = _round_up(rows, sub)
    lanes_p = _round_up(lanes, _LANE)
    padded = (rows_p, lanes_p) != (rows, lanes)

    # Flatten so spatial pixels map to the lane (fast) axis, (n, c) to rows,
    # and pad to tile-aligned sizes so every block store is dense.
    x2 = x.reshape(rows, lanes)
    if padded:
        x2 = jnp.pad(x2, ((0, rows_p - rows), (0, lanes_p - lanes)))

    # Per-row (= per (n, c)) fn parameters as column vectors for lane broadcast.
    scale2 = jnp.broadcast_to(scale.reshape(1, C), (N, C)).reshape(rows, 1)
    shift2 = jnp.broadcast_to(shift.reshape(1, C), (N, C)).reshape(rows, 1)
    if rows_p != rows:
        scale2 = jnp.pad(scale2, ((0, rows_p - rows), (0, 0)), constant_values=1.0)
        shift2 = jnp.pad(shift2, ((0, rows_p - rows), (0, 0)))
    scale2 = scale2.astype(x.dtype)
    shift2 = shift2.astype(x.dtype)

    # Draw the decision once (matches: x if random.random() > p else fn(x)).
    u = jax.random.uniform(key, ())
    apply_fn = u <= jnp.asarray(p, jnp.float32)

    # Branch in the wrapper: the identity path never launches the kernel and,
    # with buffer donation + in-place aliasing, pays no HBM traffic.
    out2 = jax.lax.cond(
        apply_fn,
        lambda xx: _apply_fn_pallas(xx, scale2, shift2),
        lambda xx: xx,
        x2,
    )
    if padded:
        out2 = out2[:rows, :lanes]
    return out2.reshape(N, C, H, W)


# Donate x so the identity branch returns it in place and the apply branch's
# aliased pallas output can reuse x's HBM buffer.
random_apply = jax.jit(_random_apply_impl, donate_argnums=(0,))


if __name__ == "__main__":
    # Donation warnings (if XLA falls back to a copy) are harmless; keep stdout clean.
    warnings.filterwarnings("ignore", message="Some donated buffers were not usable")

    key = jax.random.PRNGKey(0)
    k_x, k_apply = jax.random.split(key)

    N, C, H, W = 2, 4, 16, 16
    x = jax.random.normal(k_x, (N, C, H, W), dtype=jnp.float32)

    # Deterministic "fn" parameters (per-channel affine jitter).
    scale = 1.0 + 0.1 * jnp.arange(C, dtype=jnp.float32)   # [1.0, 1.1, 1.2, 1.3]
    shift = 0.05 * jnp.arange(C, dtype=jnp.float32)        # [0.0, 0.05, 0.1, 0.15]
    fn_ref = x * scale.reshape(1, C, 1, 1) + shift.reshape(1, C, 1, 1)

    # 1) Stochastic case (p = 0.8), checked against a pure-JAX reference.
    p = 0.8
    out = jax.block_until_ready(random_apply(x.copy(), scale, shift, p, k_apply))
    u = jax.random.uniform(k_apply, ())
    ref = jnp.where(u > p, x, fn_ref)
    assert out.shape == (N, C, H, W)
    assert jnp.allclose(out, ref, atol=1e-6), "mismatch vs reference (p=0.8)"

    # 2) Deterministic branch checks: p=1.0 always applies fn, p=0.0 never does.
    out_apply = jax.block_until_ready(random_apply(x.copy(), scale, shift, 1.0, k_apply))
    assert jnp.allclose(out_apply, fn_ref, atol=1e-6), "apply branch mismatch"
    out_id = jax.block_until_ready(random_apply(x.copy(), scale, shift, 0.0, k_apply))
    assert jnp.allclose(out_id, x, atol=1e-6), "identity branch mismatch"

    print("KERNEL_OK")
</pallas_src>

<mosaic_0001>
module attributes {stable_mosaic.version = 11 : i64} {
  func.func @_affine_kernel(%arg0: i32, %arg1: i32, %arg2: memref<8x256xf32, #tpu.memory_space<vmem>>, %arg3: memref<8x1xf32, #tpu.memory_space<vmem>>, %arg4: memref<8x1xf32, #tpu.memory_space<vmem>>, %arg5: memref<8x256xf32, #tpu.memory_space<vmem>>) attributes {dimension_semantics = [#tpu.dimension_semantics<parallel>, #tpu.dimension_semantics<parallel>], iteration_bounds = array<i64: 1, 1>, scalar_prefetch = 0 : i64, scratch_operands = 0 : i64, tpu.core_type = #tpu.core_type<tc>, window_params = [{transform_indices = @transform_0, window_bounds = array<i64: 8, 256>}, {transform_indices = @transform_1, window_bounds = array<i64: 8, 1>}, {transform_indices = @transform_2, window_bounds = array<i64: 8, 1>}, {transform_indices = @transform_3, window_bounds = array<i64: 8, 256>}]} {
    %c0 = arith.constant 0 : index
    %c0_0 = arith.constant 0 : index
    %0 = vector.load %arg2[%c0, %c0_0] : memref<8x256xf32, #tpu.memory_space<vmem>>, vector<8x256xf32>
    %c0_1 = arith.constant 0 : index
    %c0_2 = arith.constant 0 : index
    %1 = vector.load %arg3[%c0_1, %c0_2] : memref<8x1xf32, #tpu.memory_space<vmem>>, vector<8x1xf32>
    %2 = vector.broadcast %1 : vector<8x1xf32> to vector<8x256xf32>
    %3 = arith.mulf %0, %2 : vector<8x256xf32>
    %c0_3 = arith.constant 0 : index
    %c0_4 = arith.constant 0 : index
    %4 = vector.load %arg4[%c0_3, %c0_4] : memref<8x1xf32, #tpu.memory_space<vmem>>, vector<8x1xf32>
    %5 = vector.broadcast %4 : vector<8x1xf32> to vector<8x256xf32>
    %6 = arith.addf %3, %5 : vector<8x256xf32>
    %c0_5 = arith.constant 0 : index
    %c0_6 = arith.constant 0 : index
    %7 = vector.load %arg5[%c0_5, %c0_6] : memref<8x256xf32, #tpu.memory_space<vmem>>, vector<8x256xf32>
    tpu.vector_store %arg5[%c0_5, %c0_6], %6 {strides = array<i32>} : memref<8x256xf32, #tpu.memory_space<vmem>>, vector<8x256xf32>,
    return
  }
  func.func @transform_0(%arg0: i32, %arg1: i32) -> (i32, i32) {
    %c0_i32 = arith.constant 0 : i32
    return %arg0, %arg1 : i32, i32
  }
  func.func @transform_1(%arg0: i32, %arg1: i32) -> (i32, i32) {
    %c0_i32 = arith.constant 0 : i32
    %c0_i32_0 = arith.constant 0 : i32
    return %arg0, %c0_i32 : i32, i32
  }
  func.func @transform_2(%arg0: i32, %arg1: i32) -> (i32, i32) {
    %c0_i32 = arith.constant 0 : i32
    %c0_i32_0 = arith.constant 0 : i32
    return %arg0, %c0_i32 : i32, i32
  }
  func.func @transform_3(%arg0: i32, %arg1: i32) -> (i32, i32) {
    %c0_i32 = arith.constant 0 : i32
    return %arg0, %arg1 : i32, i32
  }
}

</mosaic_0001>

<bundles_post_ra>
// kernel: branch_1_fun.1
= control target key start
LH: loop header
LB: loop body
LE: loop exit
PB: predicated region body
PF: predicated region fallthrough
CT: control target
= control target key end

     0   :  { %v40_v0 = vmov 0   ;;  %s79_s1 = inlined_call_operand.vmem [shape: f32[8,1], index: 1, kind: input, shape index: {}]   ;;  %s80_s2 = inlined_call_operand.vmem [shape: f32[8,1], index: 2, kind: input, shape index: {}]   ;;  %s81_s0 = inlined_call_operand.vmem [shape: f32[8,256], index: 0, kind: input, shape index: {}, may-alias: {0,3}]   ;;  %s82_s3 = inlined_call_operand.vmem [shape: f32[8,256], index: 3, kind: output, shape index: {}, may-alias: {0,3}]  }
   0x1   :  { %39 = vset.pattern.permute.xlu0 %v40_v0  ;;  %v16_v1 = vld [vmem:[%s79_s1] sm:$0xff]  ;;  %v15_v5 = vld [vmem:[%s81_s0 + $0x8] sm:$0xff] }
   0x2   :  { %19 = vperm.xlu0 %39, %v16_v1   ;;  %v24_v2 = vld [vmem:[%s80_s2] sm:$0xff] }
   0x3   :  { %v14_v4 = vld [vmem:[%s81_s0] sm:$0xff] }
   0x6   :  { %27 = vperm.xlu0 %39, %v24_v2  }
  0x7d   :  { %v20_v3 = vpop.permute.xlu0 %19 }
  0x7e   :  { %v22_v6 = vmul.f32 %v20_v3, %v14_v4  ;;  %v23_v7 = vmul.f32 %v20_v3, %v15_v5 }
  0x81   :  { %v28_v8 = vpop.permute.xlu0 %27 }
  0x82   :  { %v30_v9 = vadd.f32 %v28_v8, %v22_v6  ;;  %v31_v10 = vadd.f32 %v28_v8, %v23_v7 }
  0x84   :  { %32 = vst [vmem:[%s82_s3] sm:$0xff] %v30_v9  ;;  %33 = vst [vmem:[%s82_s3 + $0x8] sm:$0xff] %v31_v10 }

</bundles_post_ra>
